<compile_context>
chip_gen: v6e
topology: v6e:2x2x1
jax: 0.10.0
libtpu: 0.0.40
codegen_flags: <defaults>
</compile_context>

<pallas_src>
import functools

import jax
import jax.numpy as jnp
from jax.experimental import pallas as pl
from jax.experimental.pallas import tpu as pltpu

_IN_FEATURES = 28 * 28   # 784
_OUT_FEATURES = 10
_OUT_PAD = 128           # lane-dense output width (kept at 128; 256 doubles writeback)


def _round_up(x, m):
    return (x + m - 1) // m * m


def _linear_kernel(x_ref, w_ref, b_ref, o_ref, *, compute_dtype):
    # x_ref: (tb, 784); w_ref: (784, 128) already in compute_dtype;
    # b_ref: (1, 128) f32; o_ref: (tb, 128) f32.
    x = x_ref[...].astype(compute_dtype)            # VPU cast (no-op for f32)
    acc = jnp.dot(x, w_ref[...], preferred_element_type=jnp.float32)
    o_ref[...] = (acc + b_ref[...]).astype(o_ref.dtype)


def mnist_logreg_forward(x, weight, bias, *, tile_b=2048,
                         compute_dtype=jnp.float32, return_padded=False):
    """Forward pass of MNIST_Logistic_Regression.

    x:      any shape with 784 trailing elements per example (e.g. (B,1,28,28)).
            Accepted in its native dtype (f32 / bf16 / ...); no wrapper cast.
    weight: (10, 784)  -- torch nn.Linear layout (out_features, in_features).
    bias:   (10,)
    returns (B, 10) f32 logits, or the (B, 128) padded slab if return_padded.
    """
    x2d = x.reshape(-1, _IN_FEATURES)
    B = x2d.shape[0]
    in_itemsize = jnp.dtype(x2d.dtype).itemsize
    w_itemsize = jnp.dtype(compute_dtype).itemsize

    # One-time, lane-dense parameter prep: weight transposed to (784, 128).
    w_pad = jnp.zeros((_IN_FEATURES, _OUT_PAD), compute_dtype)
    w_pad = w_pad.at[:, :_OUT_FEATURES].set(weight.astype(compute_dtype).T)
    b_pad = jnp.zeros((1, _OUT_PAD), jnp.float32).at[0, :_OUT_FEATURES].set(
        bias.astype(jnp.float32))

    # Balanced batch tiling, no padding copy of x.
    n_tiles = max(1, pl.cdiv(B, tile_b))
    if B >= 16:
        n_tiles = max(n_tiles, 2)       # >=2 grid steps so both v7x TCs get work
    if n_tiles == 1:
        tb = B                          # block == full dim: no ragged edge at all
    else:
        tb = _round_up(pl.cdiv(B, n_tiles), 8)
    grid = (pl.cdiv(B, tb),)            # last block may be ragged (clipped DMAs)

    # VMEM budget from the actual (double-buffered) tile footprint, with headroom,
    # capped generation-aware (e.g. ~48 MiB on v7x's 64 MiB VMEM).
    footprint = (2 * tb * _IN_FEATURES * in_itemsize        # x tiles (double-buffered)
                 + 2 * tb * _OUT_PAD * 4                    # out tiles (f32)
                 + 2 * _IN_FEATURES * _OUT_PAD * w_itemsize # resident weight (+spare buf)
                 + 2 * 8 * _OUT_PAD * 4)                    # bias (tile-padded)
    try:
        vmem_cap = int(pltpu.get_tpu_info().vmem_capacity_bytes)
    except Exception:
        vmem_cap = 64 << 20             # assume smallest (v7x) if query unavailable
    vmem_limit = int(min(max(2 * footprint, 16 << 20), (vmem_cap * 3) // 4))

    cost = pl.CostEstimate(
        flops=2 * B * _IN_FEATURES * _OUT_PAD,              # MXU work actually issued
        bytes_accessed=(B * _IN_FEATURES * in_itemsize      # x read
                        + _IN_FEATURES * _OUT_PAD * w_itemsize
                        + _OUT_PAD * 4
                        + B * _OUT_PAD * 4),                # padded f32 output slab
        transcendentals=0,
    )

    kernel = functools.partial(_linear_kernel, compute_dtype=compute_dtype)
    out_padded = pl.pallas_call(
        kernel,
        out_shape=jax.ShapeDtypeStruct((B, _OUT_PAD), jnp.float32),
        grid=grid,
        in_specs=[
            pl.BlockSpec((tb, _IN_FEATURES), lambda i: (i, 0)),        # x tile (pipelined)
            pl.BlockSpec((_IN_FEATURES, _OUT_PAD), lambda i: (0, 0)),  # weight (resident)
            pl.BlockSpec((1, _OUT_PAD), lambda i: (0, 0)),             # bias (resident)
        ],
        out_specs=pl.BlockSpec((tb, _OUT_PAD), lambda i: (i, 0)),
        compiler_params=pltpu.CompilerParams(
            dimension_semantics=("parallel",),
            vmem_limit_bytes=vmem_limit,
        ),
        cost_estimate=cost,
    )(x2d, w_pad, b_pad)

    if return_padded:
        return out_padded               # caller fuses the [:, :10] slice downstream
    # When jitted together with a consumer (softmax / cross_entropy) this slice
    # fuses; standalone it is one small extra copy.
    return out_padded[:, :_OUT_FEATURES]


if __name__ == "__main__":
    key = jax.random.PRNGKey(0)
    kx, kw, kb, kx2 = jax.random.split(key, 4)

    # Parameter init matching nn.Linear(784, 10): uniform(-1/sqrt(784), 1/sqrt(784)).
    bound = 1.0 / jnp.sqrt(784.0)
    weight = jax.random.uniform(kw, (_OUT_FEATURES, _IN_FEATURES), jnp.float32,
                                -bound, bound)
    bias = jax.random.uniform(kb, (_OUT_FEATURES,), jnp.float32, -bound, bound)

    fwd = jax.jit(mnist_logreg_forward,
                  static_argnames=("tile_b", "compute_dtype", "return_padded"))

    # 1) Small MNIST-like batch (NCHW like PyTorch), exact f32 path.
    B1 = 8
    x1 = jax.random.normal(kx, (B1, 1, 28, 28), dtype=jnp.float32)
    out1 = jax.block_until_ready(fwd(x1, weight, bias))
    ref1 = x1.reshape(-1, _IN_FEATURES) @ weight.T + bias
    assert out1.shape == (B1, _OUT_FEATURES)
    assert jnp.allclose(out1, ref1, atol=1e-5, rtol=1e-5)

    # 2) Ragged multi-tile batch (B not a multiple of the tile): exercises the
    #    no-pad path where Pallas clips the last block's DMAs.
    B2 = 20
    x2 = jax.random.normal(kx2, (B2, 1, 28, 28), dtype=jnp.float32)
    out2 = jax.block_until_ready(fwd(x2, weight, bias, tile_b=8))
    ref2 = x2.reshape(-1, _IN_FEATURES) @ weight.T + bias
    assert out2.shape == (B2, _OUT_FEATURES)
    assert jnp.allclose(out2, ref2, atol=1e-5, rtol=1e-5)

    # 3) bf16 MXU path (f32 accumulation) — looser tolerance for the bf16 cast.
    out3 = jax.block_until_ready(fwd(x1, weight, bias, compute_dtype=jnp.bfloat16))
    assert out3.shape == (B1, _OUT_FEATURES)
    assert jnp.allclose(out3, ref1, atol=5e-2, rtol=5e-2)

    print("KERNEL_OK")
</pallas_src>

<mosaic_0001>
module attributes {stable_mosaic.version = 11 : i64} {
  func.func @_linear_kernel(%arg0: i32, %arg1: memref<8x784xf32, #tpu.memory_space<vmem>>, %arg2: memref<784x128xf32, #tpu.memory_space<vmem>>, %arg3: memref<1x128xf32, #tpu.memory_space<vmem>>, %arg4: memref<8x128xf32, #tpu.memory_space<vmem>>) attributes {dimension_semantics = [#tpu.dimension_semantics<parallel>], iteration_bounds = array<i64: 1>, scalar_prefetch = 0 : i64, scratch_operands = 0 : i64, tpu.core_type = #tpu.core_type<tc>, window_params = [{transform_indices = @transform_0, window_bounds = array<i64: 8, 784>}, {pipeline_mode = #tpu.pipeline_mode<synchronous>, transform_indices = @transform_1, window_bounds = array<i64: 784, 128>}, {pipeline_mode = #tpu.pipeline_mode<synchronous>, transform_indices = @transform_2, window_bounds = array<i64: 1, 128>}, {transform_indices = @transform_3, window_bounds = array<i64: 8, 128>}]} {
    %c0 = arith.constant 0 : index
    %c0_0 = arith.constant 0 : index
    %0 = vector.load %arg1[%c0, %c0_0] : memref<8x784xf32, #tpu.memory_space<vmem>>, vector<8x784xf32>
    %c0_1 = arith.constant 0 : index
    %c0_2 = arith.constant 0 : index
    %1 = vector.load %arg2[%c0_1, %c0_2] : memref<784x128xf32, #tpu.memory_space<vmem>>, vector<784x128xf32>
    %cst = arith.constant dense<0.000000e+00> : vector<8x128xf32>
    %2 = tpu.matmul %0, %1, %cst {dimension_numbers = #tpu.dot_dimension_numbers<[1], [0], [0], [1], [0, 0, 1, 1], [], []>} : vector<8x784xf32>, vector<784x128xf32>, vector<8x128xf32> -> vector<8x128xf32>
    %c0_3 = arith.constant 0 : index
    %c0_4 = arith.constant 0 : index
    %3 = vector.load %arg3[%c0_3, %c0_4] : memref<1x128xf32, #tpu.memory_space<vmem>>, vector<1x128xf32>
    %4 = vector.broadcast %3 : vector<1x128xf32> to vector<8x128xf32>
    %5 = arith.addf %2, %4 : vector<8x128xf32>
    %c0_5 = arith.constant 0 : index
    %c0_6 = arith.constant 0 : index
    %6 = vector.load %arg4[%c0_5, %c0_6] : memref<8x128xf32, #tpu.memory_space<vmem>>, vector<8x128xf32>
    tpu.vector_store %arg4[%c0_5, %c0_6], %5 {strides = array<i32>} : memref<8x128xf32, #tpu.memory_space<vmem>>, vector<8x128xf32>,
    return
  }
  func.func @transform_0(%arg0: i32) -> (i32, i32) {
    %c0_i32 = arith.constant 0 : i32
    %c0_i32_0 = arith.constant 0 : i32
    return %arg0, %c0_i32 : i32, i32
  }
  func.func @transform_1(%arg0: i32) -> (i32, i32) {
    %c0_i32 = arith.constant 0 : i32
    %c0_i32_0 = arith.constant 0 : i32
    %c0_i32_1 = arith.constant 0 : i32
    return %c0_i32, %c0_i32_0 : i32, i32
  }
  func.func @transform_2(%arg0: i32) -> (i32, i32) {
    %c0_i32 = arith.constant 0 : i32
    %c0_i32_0 = arith.constant 0 : i32
    %c0_i32_1 = arith.constant 0 : i32
    return %c0_i32, %c0_i32_0 : i32, i32
  }
  func.func @transform_3(%arg0: i32) -> (i32, i32) {
    %c0_i32 = arith.constant 0 : i32
    %c0_i32_0 = arith.constant 0 : i32
    return %arg0, %c0_i32 : i32, i32
  }
}

</mosaic_0001>

<bundles_post_ra>
// kernel: mnist_logreg_forward.1
= control target key start
LH: loop header
LB: loop body
LE: loop exit
PB: predicated region body
PF: predicated region fallthrough
CT: control target
= control target key end

     0   :  { %s912_s0 = inlined_call_operand.vmem [shape: f32[8,784], index: 0, kind: input, shape index: {}]   ;;  %s913_s1 = inlined_call_operand.vmem [shape: f32[784,128], index: 1, kind: input, shape index: {}]   ;;  %s914_s2 = inlined_call_operand.vmem [shape: f32[1,128], index: 2, kind: input, shape index: {}]   ;;  %s915_s3 = inlined_call_operand.hbm [shape: f32[8,128], index: 3, kind: output, shape index: {}]  }
   0x1   :  { %v53_v0 = vld [vmem:[%s913_s1 + $0xf8] sm:$0xff]  ;;  %v52_v2 = vld [vmem:[%s913_s1 + $0xf0] sm:$0xff]  ;;  %v51_v6 = vld [vmem:[%s913_s1 + $0xe8] sm:$0xff] }
   0x2   :  { %v37_v1 = vld [vmem:[%s913_s1 + $0x78] sm:$0xff]  ;;  %428 = vmatprep.subr.mxu0 %v53_v0  ;;  %v36_v4 = vld [vmem:[%s913_s1 + $0x70] sm:$0xff]  ;;  %v35_v8 = vld [vmem:[%s913_s1 + $0x68] sm:$0xff] }
   0x3   :  { %v85_v3 = vld [vmem:[%s913_s1 + $0x1f8] sm:$0xff]  ;;  %429 = vmatpush3.msra.mxu0 %v37_v1  ;;  %v84_v7 = vld [vmem:[%s913_s1 + $0x1f0] sm:$0xff]  ;;  %v83_v10 = vld [vmem:[%s913_s1 + $0x1e8] sm:$0xff] }
   0x4   :  { %v69_v5 = vld [vmem:[%s913_s1 + $0x178] sm:$0xff]  ;;  %463 = vmatprep.subr.mxu1 %v85_v3  ;;  %430 = vmatprep.subr.mxu0 %v52_v2  ;;  %v68_v9 = vld [vmem:[%s913_s1 + $0x170] sm:$0xff]  ;;  %v50_v11 = vld [vmem:[%s913_s1 + $0xe0] sm:$0xff] }
   0x5   :  { %464 = vmatpush3.msra.mxu1 %v69_v5  ;;  %431 = vmatpush3.msra.mxu0 %v36_v4  ;;  %v67_v12 = vld [vmem:[%s913_s1 + $0x168] sm:$0xff]  ;;  %v34_v13 = vld [vmem:[%s913_s1 + $0x60] sm:$0xff]  ;;  %v49_v15 = vld [vmem:[%s913_s1 + $0xd8] sm:$0xff] }
   0x6   :  { %465 = vmatprep.subr.mxu1 %v84_v7  ;;  %432 = vmatprep.subr.mxu0 %v51_v6  ;;  %v82_v14 = vld [vmem:[%s913_s1 + $0x1e0] sm:$0xff]  ;;  %v33_v17 = vld [vmem:[%s913_s1 + $0x58] sm:$0xff]  ;;  %v48_v19 = vld [vmem:[%s913_s1 + $0xd0] sm:$0xff] }
   0x7   :  { %466 = vmatpush3.msra.mxu1 %v68_v9  ;;  %433 = vmatpush3.msra.mxu0 %v35_v8  ;;  %v66_v16 = vld [vmem:[%s913_s1 + $0x160] sm:$0xff]  ;;  %v81_v18 = vld [vmem:[%s913_s1 + $0x1d8] sm:$0xff]  ;;  %v32_v21 = vld [vmem:[%s913_s1 + $0x50] sm:$0xff] }
   0x8   :  { %467 = vmatprep.subr.mxu1 %v83_v10  ;;  %434 = vmatprep.subr.mxu0 %v50_v11  ;;  %v65_v20 = vld [vmem:[%s913_s1 + $0x158] sm:$0xff]  ;;  %v80_v22 = vld [vmem:[%s913_s1 + $0x1d0] sm:$0xff]  ;;  %v47_v23 = vld [vmem:[%s913_s1 + $0xc8] sm:$0xff] }
   0x9   :  { %468 = vmatpush3.msra.mxu1 %v67_v12  ;;  %435 = vmatpush3.msra.mxu0 %v34_v13  ;;  %v64_v24 = vld [vmem:[%s913_s1 + $0x150] sm:$0xff]  ;;  %v31_v25 = vld [vmem:[%s913_s1 + $0x48] sm:$0xff]  ;;  %v46_v27 = vld [vmem:[%s913_s1 + $0xc0] sm:$0xff] }
   0xa   :  { %469 = vmatprep.subr.mxu1 %v82_v14  ;;  %436 = vmatprep.subr.mxu0 %v49_v15  ;;  %v79_v26 = vld [vmem:[%s913_s1 + $0x1c8] sm:$0xff]  ;;  %v30_v29 = vld [vmem:[%s913_s1 + $0x40] sm:$0xff]  ;;  %v45_v31 = vld [vmem:[%s913_s1 + $0xb8] sm:$0xff] }
   0xb   :  { %470 = vmatpush3.msra.mxu1 %v66_v16  ;;  %437 = vmatpush3.msra.mxu0 %v33_v17  ;;  %v63_v28 = vld [vmem:[%s913_s1 + $0x148] sm:$0xff]  ;;  %v78_v30 = vld [vmem:[%s913_s1 + $0x1c0] sm:$0xff]  ;;  %v29_v33 = vld [vmem:[%s913_s1 + $0x38] sm:$0xff] }
   0xc   :  { %471 = vmatprep.subr.mxu1 %v81_v18  ;;  %438 = vmatprep.subr.mxu0 %v48_v19  ;;  %v62_v32 = vld [vmem:[%s913_s1 + $0x140] sm:$0xff]  ;;  %v77_v34 = vld [vmem:[%s913_s1 + $0x1b8] sm:$0xff]  ;;  %v44_v35 = vld [vmem:[%s913_s1 + $0xb0] sm:$0xff] }
   0xd   :  { %472 = vmatpush3.msra.mxu1 %v65_v20  ;;  %439 = vmatpush3.msra.mxu0 %v32_v21  ;;  %v61_v36 = vld [vmem:[%s913_s1 + $0x138] sm:$0xff]  ;;  %v28_v37 = vld [vmem:[%s913_s1 + $0x30] sm:$0xff]  ;;  %v43_v39 = vld [vmem:[%s913_s1 + $0xa8] sm:$0xff] }
   0xe   :  { %473 = vmatprep.subr.mxu1 %v80_v22  ;;  %440 = vmatprep.subr.mxu0 %v47_v23  ;;  %v76_v38 = vld [vmem:[%s913_s1 + $0x1b0] sm:$0xff]  ;;  %v27_v41 = vld [vmem:[%s913_s1 + $0x28] sm:$0xff]  ;;  %v42_v43 = vld [vmem:[%s913_s1 + $0xa0] sm:$0xff] }
   0xf   :  { %474 = vmatpush3.msra.mxu1 %v64_v24  ;;  %441 = vmatpush3.msra.mxu0 %v31_v25  ;;  %v60_v40 = vld [vmem:[%s913_s1 + $0x130] sm:$0xff]  ;;  %v75_v42 = vld [vmem:[%s913_s1 + $0x1a8] sm:$0xff]  ;;  %v26_v45 = vld [vmem:[%s913_s1 + $0x20] sm:$0xff] }
  0x10   :  { %475 = vmatprep.subr.mxu1 %v79_v26  ;;  %442 = vmatprep.subr.mxu0 %v46_v27  ;;  %v59_v44 = vld [vmem:[%s913_s1 + $0x128] sm:$0xff]  ;;  %v74_v46 = vld [vmem:[%s913_s1 + $0x1a0] sm:$0xff]  ;;  %v41_v47 = vld [vmem:[%s913_s1 + $0x98] sm:$0xff] }
  0x11   :  { %476 = vmatpush3.msra.mxu1 %v63_v28  ;;  %443 = vmatpush3.msra.mxu0 %v30_v29  ;;  %v58_v48 = vld [vmem:[%s913_s1 + $0x120] sm:$0xff]  ;;  %v25_v49 = vld [vmem:[%s913_s1 + $0x18] sm:$0xff]  ;;  %v40_v51 = vld [vmem:[%s913_s1 + $0x90] sm:$0xff] }
  0x12   :  { %477 = vmatprep.subr.mxu1 %v78_v30  ;;  %444 = vmatprep.subr.mxu0 %v45_v31  ;;  %v73_v50 = vld [vmem:[%s913_s1 + $0x198] sm:$0xff]  ;;  %v24_v53 = vld [vmem:[%s913_s1 + $0x10] sm:$0xff]  ;;  %v39_v55 = vld [vmem:[%s913_s1 + $0x88] sm:$0xff] }
  0x13   :  { %478 = vmatpush3.msra.mxu1 %v62_v32  ;;  %445 = vmatpush3.msra.mxu0 %v29_v33  ;;  %v57_v52 = vld [vmem:[%s913_s1 + $0x118] sm:$0xff]  ;;  %v72_v54 = vld [vmem:[%s913_s1 + $0x190] sm:$0xff]  ;;  %v23_v57 = vld [vmem:[%s913_s1 + $0x8] sm:$0xff] }
  0x14   :  { %479 = vmatprep.subr.mxu1 %v77_v34  ;;  %446 = vmatprep.subr.mxu0 %v44_v35  ;;  %v56_v56 = vld [vmem:[%s913_s1 + $0x110] sm:$0xff]  ;;  %v71_v58 = vld [vmem:[%s913_s1 + $0x188] sm:$0xff]  ;;  %v38_v59 = vld [vmem:[%s913_s1 + $0x80] sm:$0xff] }
  0x15   :  { %480 = vmatpush3.msra.mxu1 %v61_v36  ;;  %447 = vmatpush3.msra.mxu0 %v28_v37  ;;  %v16_v60 = vld [vmem:[%s912_s0 + $0x8] sm:$0xff]  ;;  %v22_v61 = vld [vmem:[%s913_s1] sm:$0xff]  ;;  %v117_v1 = vld [vmem:[%s913_s1 + $0x2f8] sm:$0xff] }
  0x16   :  { %481 = vmatprep.subr.mxu1 %v76_v38  ;;  %448 = vmatprep.subr.mxu0 %v43_v39  ;;  %v55_v62 = vld [vmem:[%s913_s1 + $0x108] sm:$0xff]  ;;  %v15_v63 = vld [vmem:[%s912_s0] sm:$0xff]  ;;  %v18_v3 = vld [vmem:[%s912_s0 + $0x18] sm:$0xff] }
  0x17   :  { %482 = vmatpush3.msra.mxu1 %v60_v40  ;;  %449 = vmatpush3.msra.mxu0 %v27_v41  ;;  %v70_v0 = vld [vmem:[%s913_s1 + $0x180] sm:$0xff]  ;;  %v101_v4 = vld [vmem:[%s913_s1 + $0x278] sm:$0xff]  ;;  %v17_v5 = vld [vmem:[%s912_s0 + $0x10] sm:$0xff] }
  0x18   :  { %483 = vmatprep.subr.mxu1 %v75_v42  ;;  %450 = vmatprep.subr.mxu0 %v42_v43  ;;  %v54_v2 = vld [vmem:[%s913_s1 + $0x100] sm:$0xff]  ;;  %v116_v6 = vld [vmem:[%s913_s1 + $0x2f0] sm:$0xff]  ;;  %v20_v8 = vld [vmem:[%s912_s0 + $0x28] sm:$0xff] }
  0x19   :  { %484 = vmatpush3.msra.mxu1 %v59_v44  ;;  %451 = vmatpush3.msra.mxu0 %v26_v45  ;;  %v100_v7 = vld [vmem:[%s913_s1 + $0x270] sm:$0xff]  ;;  %v115_v9 = vld [vmem:[%s913_s1 + $0x2e8] sm:$0xff] }
  0x1a   :  { %485 = vmatprep.subr.mxu1 %v74_v46  ;;  %452 = vmatprep.subr.mxu0 %v41_v47 }
  0x1b   :  { %486 = vmatpush3.msra.mxu1 %v58_v48  ;;  %453 = vmatpush3.msra.mxu0 %v25_v49 }
  0x1c   :  { %487 = vmatprep.subr.mxu1 %v73_v50  ;;  %454 = vmatprep.subr.mxu0 %v40_v51 }
  0x1d   :  { %488 = vmatpush3.msra.mxu1 %v57_v52  ;;  %455 = vmatpush3.msra.mxu0 %v24_v53 }
  0x1e   :  { %489 = vmatprep.subr.mxu1 %v72_v54  ;;  %456 = vmatprep.subr.mxu0 %v39_v55 }
  0x1f   :  { %490 = vmatpush3.msra.mxu1 %v56_v56  ;;  %457 = vmatpush3.msra.mxu0 %v23_v57 }
  0x20   :  { %491 = vmatprep.subr.mxu1 %v71_v58  ;;  %458 = vmatprep.subr.mxu0 %v38_v59 }
  0x21   :  { %195 = vmatprep.mubr.f32.mxu0 %v16_v60  ;;  %459 = vmatpush3.msra.mxu0 %v22_v61 }
  0x22   :  { %492 = vmatpush3.msra.mxu1 %v55_v62  ;;  %196 = vmatmul.mubr.f32.vlgmr.msra.gmra.mxu0 %v15_v63 }
  0x23   :  { %493 = vmatprep.subr.mxu1 %v70_v0  ;;  %498 = vmatprep.subr.mxu0 %v117_v1 }
  0x24   :  { %494 = vmatpush3.msra.mxu1 %v54_v2  ;;  %265 = vmatprep.mubr.f32.mxu1 %v18_v3 }
  0x25   :  { %499 = vmatpush3.msra.mxu0 %v101_v4 }
  0x26   :  { %8 = vsyncpa [#allocation3], 0  ;;  %266 = vmatmul.mubr.f32.vlgmr.msra.gmra.mxu1 %v17_v5  ;;  %500 = vmatprep.subr.mxu0 %v116_v6  ;;  %v99_v10 = vld [vmem:[%s913_s1 + $0x268] sm:$0xff]  ;;  %v114_v12 = vld [vmem:[%s913_s1 + $0x2e0] sm:$0xff]  ;;  %v568_v14 = vmov 0.0   ;;  %vm127_vm0 = vcmask 130048  }
  0x27   :  { %v119_v11 = vld [vmem:[%s913_s1 + $0x308] sm:$0xff]  ;;  %501 = vmatpush3.msra.mxu0 %v100_v7  ;;  %335 = vmatprep.mubr.f32.mxu0 %v20_v8  ;;  %v98_v13 = vld [vmem:[%s913_s1 + $0x260] sm:$0xff]  ;;  %v113_v16 = vld [vmem:[%s913_s1 + $0x2d8] sm:$0xff]  ;;  %vm569_vm1 = vmmov 0  }
  0x28   :  { %502 = vmatprep.subr.mxu0 %v115_v9  ;;  %536 = vmatprep.subr.mxu1 %v568_v14  ;;  %v118_v15 = vld [vmem:[%s913_s1 + $0x300] sm:$0xff]  ;;  %v97_v17 = vld [vmem:[%s913_s1 + $0x258] sm:$0xff]  ;;  %v21_v18 = vld [vmem:[%s912_s0 + $0x30] sm:$0xff] }
  0x29   :  { %503 = vmatpush3.msra.mxu0 %v99_v10  ;;  %537 = vmatpush3.msra.mxu1 %v119_v11  ;;  %v112_v19 = vld [vmem:[%s913_s1 + $0x2d0] sm:$0xff]  ;;  %v111_v21 = vld [vmem:[%s913_s1 + $0x2c8] sm:$0xff]  ;;  %v110_v23 = vld [vmem:[%s913_s1 + $0x2c0] sm:$0xff] }
  0x2a   :  { %504 = vmatprep.subr.mxu0 %v114_v12  ;;  %538 = vmatprep.subr.mxu1 %v568_v14  ;;  %v96_v20 = vld [vmem:[%s913_s1 + $0x250] sm:$0xff]  ;;  %v95_v22 = vld [vmem:[%s913_s1 + $0x248] sm:$0xff]  ;;  %v94_v24 = vld [vmem:[%s913_s1 + $0x240] sm:$0xff] }
  0x2b   :  { %505 = vmatpush3.msra.mxu0 %v98_v13  ;;  %539 = vmatpush3.msra.mxu1 %v118_v15  ;;  %v109_v25 = vld [vmem:[%s913_s1 + $0x2b8] sm:$0xff]  ;;  %v108_v27 = vld [vmem:[%s913_s1 + $0x2b0] sm:$0xff]  ;;  %v107_v29 = vld [vmem:[%s913_s1 + $0x2a8] sm:$0xff] }
  0x2c   :  { %506 = vmatprep.subr.mxu0 %v113_v16  ;;  %540 = vmatprep.mubr.msk.f32.mxu1 %vm569_vm1, %v568_v14  ;;  %v93_v26 = vld [vmem:[%s913_s1 + $0x238] sm:$0xff]  ;;  %v92_v28 = vld [vmem:[%s913_s1 + $0x230] sm:$0xff]  ;;  %v91_v30 = vld [vmem:[%s913_s1 + $0x228] sm:$0xff] }
  0x2d   :  { %507 = vmatpush3.msra.mxu0 %v97_v17  ;;  %541 = vmatmul.mubr.msk.f32.vlgmr.msra.gmra.mxu1 %vm127_vm0, %v21_v18  ;;  %v106_v31 = vld [vmem:[%s913_s1 + $0x2a0] sm:$0xff]  ;;  %v105_v33 = vld [vmem:[%s913_s1 + $0x298] sm:$0xff]  ;;  %v104_v35 = vld [vmem:[%s913_s1 + $0x290] sm:$0xff] }
  0x2e   :  { %508 = vmatprep.subr.mxu0 %v112_v19  ;;  %v90_v32 = vld [vmem:[%s913_s1 + $0x220] sm:$0xff]  ;;  %v89_v34 = vld [vmem:[%s913_s1 + $0x218] sm:$0xff]  ;;  %v88_v36 = vld [vmem:[%s913_s1 + $0x210] sm:$0xff] }
  0x2f   :  { %509 = vmatpush3.msra.mxu0 %v96_v20  ;;  %v103_v37 = vld [vmem:[%s913_s1 + $0x288] sm:$0xff]  ;;  %v102_v39 = vld [vmem:[%s913_s1 + $0x280] sm:$0xff] }
  0x30   :  { %510 = vmatprep.subr.mxu0 %v111_v21  ;;  %v87_v38 = vld [vmem:[%s913_s1 + $0x208] sm:$0xff]  ;;  %v86_v40 = vld [vmem:[%s913_s1 + $0x200] sm:$0xff] }
  0x31   :  { %511 = vmatpush3.msra.mxu0 %v95_v22  ;;  %v19_v41 = vld [vmem:[%s912_s0 + $0x20] sm:$0xff]  ;;  %s570_s0 = smov [#allocation2]  }
  0x32   :  { %512 = vmatprep.subr.mxu0 %v110_v23  ;;  %v426_v49 = vld [vmem:[%s914_s2] ss:$0 sm:$0xff]  ;;  %s418_s1 = sshll.u32 %s570_s0, 4  ;;  %s419_s1 = int_to_ptr.vmem [resolvable:$true] %s418_s1 }
  0x33   :  { %513 = vmatpush3.msra.mxu0 %v94_v24  ;;  %s546_s8 = scalar_lea.vmem %s419_s1, 128  ;;  %p551_p1 = scmp.lt.s32.totalorder %s419_s1, %s419_s1 }
  0x34   :  { %514 = vmatprep.subr.mxu0 %v109_v25  ;;  %p547_p0 = scmp.ne.s32.totalorder %s419_s1, %s546_s8  ;;  %p552_p2 = scmp.lt.s32.totalorder %s546_s8, %s546_s8 }
  0x35   :  { %515 = vmatpush3.msra.mxu0 %v93_v26 }
  0x36   :  { %516 = vmatprep.subr.mxu0 %v108_v27  ;;  %p553_p3 = por %p552_p2, %p551_p1 }
  0x37   :  { %517 = vmatpush3.msra.mxu0 %v92_v28 }
  0x38   :  { %518 = vmatprep.subr.mxu0 %v107_v29  ;;  %p554_p4 = pnand %p553_p3, %p547_p0 }
  0x39   :  { %519 = vmatpush3.msra.mxu0 %v91_v30 }
  0x3a   :  { %520 = vmatprep.subr.mxu0 %v106_v31 }
  0x3b   :  { %521 = vmatpush3.msra.mxu0 %v90_v32 }
  0x3c   :  { %522 = vmatprep.subr.mxu0 %v105_v33 }
  0x3d   :  { %523 = vmatpush3.msra.mxu0 %v89_v34 }
  0x3e   :  { %524 = vmatprep.subr.mxu0 %v104_v35 }
  0x3f   :  { %525 = vmatpush3.msra.mxu0 %v88_v36 }
  0x40   :  { %526 = vmatprep.subr.mxu0 %v103_v37 }
  0x41   :  { %527 = vmatpush3.msra.mxu0 %v87_v38 }
  0x42   :  { %528 = vmatprep.subr.mxu0 %v102_v39 }
  0x43   :  { %529 = vmatpush3.msra.mxu0 %v86_v40 }
  0x44   :  { %336 = vmatmul.mubr.f32.vlgmr.msra.gmra.mxu0 %v19_v41 }
  0xe2   :  { %v460_v46 = vpop.f32.mrf.mxu0 }
  0xe4   :  { %v461_v47 = vpop.f32.mrf.mxu0 }
  0xe5   :  { %v462_v48 = vadd.f32 %v461_v47, %v460_v46 }
  0xe6   :  { %v495_v42 = vpop.f32.mrf.mxu1 }
  0xe7   :  { %v198_v50 = vadd.f32 %v462_v48, %v426_v49 }
  0xe8   :  { %v496_v43 = vpop.f32.mrf.mxu1 }
  0xe9   :  { %v497_v51 = vadd.f32 %v496_v43, %v495_v42 }
  0xeb   :  { %v268_v54 = vadd.f32 %v497_v51, %v198_v50 }
  0xed   :  { %v407_v44 = vpop.f32.mrf.mxu1 }
  0xef   :  { %v542_v45 = vpop.f32.mrf.mxu1 }
 0x104   :  { %v530_v52 = vpop.f32.mrf.mxu0 }
 0x106   :  { %v531_v53 = vpop.f32.mrf.mxu0 }
 0x107   :  { %v532_v55 = vadd.f32 %v531_v53, %v530_v52 }
 0x109   :  { %v338_v56 = vadd.f32 %v532_v55, %v268_v54 }
 0x10b   :  { %v408_v57 = vadd.f32 %v407_v44, %v338_v56 }
 0x10d   :  { %411 = vst [vmem:[#allocation2] sm:$0xff] %v408_v57 }
 0x10e   :  { %557 = shalt.err (!%p554_p4)
}
 0x10f   :  { %421 = dma.vmem_to_hbm [thread:$0]  %s419_s1, 128, %s915_s3, [#allocation3]  }
 0x110   :  { %566 = dma.done.wait [#allocation3], 128  }
 0x111   :  { %567 = vsyncadd [#allocation3], 4294967168 }
 0x112   :  { %425 = vsyncpa [#allocation3], 1 }

</bundles_post_ra>
